<compile_context>
chip_gen: v7x
topology: tpu7x:2x2x1
jax: 0.10.0
libtpu: 0.0.40
codegen_flags: <defaults>
</compile_context>

<pallas_src>
import functools

import jax
import jax.numpy as jnp
from jax.experimental import pallas as pl
from jax.experimental.pallas import tpu as pltpu


def _actor_critic_kernel(x_ref, w1_ref, b1_ref, w2_ref, b2_ref, out_ref, *,
                         action_space):
    f32 = jnp.float32

    # Shared trunk: h = relu(x @ W1 + b1), accumulated in f32 on the MXU.
    x = x_ref[...]                                                   # [TB, S]
    h = jnp.dot(x, w1_ref[...], preferred_element_type=f32) + b1_ref[...]
    h = jnp.maximum(h, 0.0)                                          # [TB, H] f32
    h = h.astype(w2_ref.dtype)                                       # bf16 for MXU

    # Fused head: columns [0, A) = actor logits, column A = critic value,
    # columns (A, P) = zero padding (zero weights / bias).
    z = jnp.dot(h, w2_ref[...], preferred_element_type=f32) + b2_ref[...]  # [TB, P]

    col = jax.lax.broadcasted_iota(jnp.int32, z.shape, dimension=1)
    is_actor = col < action_space
    is_critic = col == action_space

    # Masked softmax over actor columns only.  exp(-inf) = 0 handles the
    # critic / pad lanes, so no second mask on the exponentials is needed.
    masked_logits = jnp.where(is_actor, z, -jnp.inf)
    m = jnp.max(masked_logits, axis=1, keepdims=True)                # [TB, 1]
    e = jnp.exp(masked_logits - m)                                   # 0 outside actor
    denom = jnp.sum(e, axis=1, keepdims=True)                        # [TB, 1]
    prob = e * pl.reciprocal(denom, approx=True)                     # 0 outside actor

    # Lane-dense output slab: prob in actor columns, value in column A, 0 pad.
    out = prob + jnp.where(is_critic, z, 0.0)
    out_ref[...] = out.astype(out_ref.dtype)


@functools.partial(jax.jit, static_argnames=("block_b", "use_bf16"))
def actor_critic_forward(x, w1, b1, wa, ba, wc, bc, *, block_b=256,
                         use_bf16=True):
    """Returns (prob [B, action_space], value [B, 1])."""
    f32 = jnp.float32
    compute_dtype = jnp.bfloat16 if use_bf16 else jnp.float32

    B, S = x.shape
    H = w1.shape[1]
    A = wa.shape[1]
    P = pl.cdiv(A + 1, 128) * 128            # lane-dense padded head width

    # Fused head weights / bias: [H, P] / [1, P], zero-padded past column A.
    w2 = jnp.zeros((H, P), f32).at[:, :A].set(wa).at[:, A].set(wc[:, 0])
    b2 = jnp.zeros((1, P), f32).at[:, :A].set(ba).at[:, A].set(bc[:, 0])

    # bf16 matmul operands, f32 biases (added to the f32 accumulators).
    xc = x.astype(compute_dtype)
    w1c = w1.astype(compute_dtype)
    w2c = w2.astype(compute_dtype)
    b1f = b1.astype(f32)
    b2f = b2.astype(f32)

    # Batch tiling: TB rows per grid step, TB a multiple of 8 (sublane-aligned).
    TB = block_b if B >= block_b else B
    TB = pl.cdiv(TB, 8) * 8
    B_pad = pl.cdiv(B, TB) * TB
    if B_pad != B:
        xc = jnp.pad(xc, ((0, B_pad - B), (0, 0)))
    grid = (B_pad // TB,)

    kernel = functools.partial(_actor_critic_kernel, action_space=A)

    out = pl.pallas_call(
        kernel,
        out_shape=jax.ShapeDtypeStruct((B_pad, P), f32),
        grid_spec=pltpu.PrefetchScalarGridSpec(
            num_scalar_prefetch=0,
            grid=grid,
            in_specs=[
                pl.BlockSpec((TB, S), lambda i: (i, 0)),   # x: tiled over batch
                pl.BlockSpec((S, H), lambda i: (0, 0)),    # W1: VMEM-resident
                pl.BlockSpec((1, H), lambda i: (0, 0)),    # b1: VMEM-resident
                pl.BlockSpec((H, P), lambda i: (0, 0)),    # fused head W: resident
                pl.BlockSpec((1, P), lambda i: (0, 0)),    # fused head b: resident
            ],
            out_specs=pl.BlockSpec((TB, P), lambda i: (i, 0)),
        ),
        compiler_params=pltpu.CompilerParams(
            dimension_semantics=("parallel",),             # shard batch over TCs
        ),
    )(xc, w1c, b1f, w2c, b2f)

    out = out[:B]
    prob = out[:, :A]
    v = out[:, A:A + 1]
    return prob, v


def init_params(key, state_num, hidden_state, action_space):
    """Deterministic init mimicking nn.Linear default (uniform(-1/sqrt(fan_in), .))."""
    k1, k2, k3, k4, k5, k6 = jax.random.split(key, 6)

    def lin(kw, kb, fan_in, fan_out):
        bound = 1.0 / jnp.sqrt(float(fan_in))
        w = jax.random.uniform(kw, (fan_in, fan_out), jnp.float32, -bound, bound)
        b = jax.random.uniform(kb, (1, fan_out), jnp.float32, -bound, bound)
        return w, b

    w1, b1 = lin(k1, k2, state_num, hidden_state)       # fc_1
    wa, ba = lin(k3, k4, hidden_state, action_space)    # fc_actor
    wc, bc = lin(k5, k6, hidden_state, 1)               # fc_critic
    return w1, b1, wa, ba, wc, bc


def reference_forward(x, w1, b1, wa, ba, wc, bc, compute_dtype=jnp.float32):
    """Pure-JAX reference with matching cast discipline (f32 accumulation)."""
    f32 = jnp.float32
    cd = compute_dtype
    h = jnp.maximum(
        jnp.dot(x.astype(cd), w1.astype(cd), preferred_element_type=f32) + b1, 0.0)
    hc = h.astype(cd)
    logits = jnp.dot(hc, wa.astype(cd), preferred_element_type=f32) + ba
    prob = jax.nn.softmax(logits, axis=1)
    v = jnp.dot(hc, wc.astype(cd), preferred_element_type=f32) + bc
    return prob, v


if __name__ == "__main__":
    # Small config consistent with the module: config.state_num,
    # config.hidden_state, config.action_space.
    batch, state_num, hidden_state, action_space = 8, 32, 32, 16

    key = jax.random.PRNGKey(0)
    kx, kp = jax.random.split(key)
    x = jax.random.normal(kx, (batch, state_num), jnp.float32)
    params = init_params(kp, state_num, hidden_state, action_space)

    # --- f32 path (tight check vs. f32 reference) ---
    prob32, v32 = actor_critic_forward(x, *params, use_bf16=False)
    jax.block_until_ready((prob32, v32))
    prob_ref32, v_ref32 = reference_forward(x, *params, compute_dtype=jnp.float32)
    assert jnp.allclose(v32, v_ref32, atol=1e-5, rtol=1e-5)
    # prob uses the EUP approximate reciprocal -> slightly looser tolerance.
    assert jnp.allclose(prob32, prob_ref32, atol=5e-3, rtol=5e-3)
    assert jnp.allclose(jnp.sum(prob32, axis=1), 1.0, atol=5e-3)

    # --- default bf16 path (checked vs. bf16-cast reference) ---
    prob, v = actor_critic_forward(x, *params)
    jax.block_until_ready((prob, v))
    prob_refb, v_refb = reference_forward(x, *params, compute_dtype=jnp.bfloat16)
    assert jnp.allclose(prob, prob_refb, atol=5e-3, rtol=5e-3)
    assert jnp.allclose(v, v_refb, atol=5e-3, rtol=5e-3)
    assert jnp.allclose(jnp.sum(prob, axis=1), 1.0, atol=5e-3)

    # TODO(synk): the gat_use branches (GraphNN / StateNN / Adj_Gen in forward,
    # forward_state, forward_gcn) depend on external classes not defined in the
    # module and are not implemented here.
    print("KERNEL_OK")
</pallas_src>

<mosaic_0001>
module attributes {stable_mosaic.version = 11 : i64} {
  func.func @_actor_critic_kernel(%arg0: i32, %arg1: memref<8x32xf32, #tpu.memory_space<vmem>>, %arg2: memref<32x32xf32, #tpu.memory_space<vmem>>, %arg3: memref<1x32xf32, #tpu.memory_space<vmem>>, %arg4: memref<32x128xf32, #tpu.memory_space<vmem>>, %arg5: memref<1x128xf32, #tpu.memory_space<vmem>>, %arg6: memref<8x128xf32, #tpu.memory_space<vmem>>) attributes {dimension_semantics = [#tpu.dimension_semantics<parallel>], iteration_bounds = array<i64: 1>, scalar_prefetch = 0 : i64, scratch_operands = 0 : i64, tpu.core_type = #tpu.core_type<tc>, window_params = [{transform_indices = @transform_0, window_bounds = array<i64: 8, 32>}, {pipeline_mode = #tpu.pipeline_mode<synchronous>, transform_indices = @transform_1, window_bounds = array<i64: 32, 32>}, {pipeline_mode = #tpu.pipeline_mode<synchronous>, transform_indices = @transform_2, window_bounds = array<i64: 1, 32>}, {pipeline_mode = #tpu.pipeline_mode<synchronous>, transform_indices = @transform_3, window_bounds = array<i64: 32, 128>}, {pipeline_mode = #tpu.pipeline_mode<synchronous>, transform_indices = @transform_4, window_bounds = array<i64: 1, 128>}, {transform_indices = @transform_5, window_bounds = array<i64: 8, 128>}]} {
    %c0 = arith.constant 0 : index
    %c0_0 = arith.constant 0 : index
    %0 = vector.load %arg1[%c0, %c0_0] : memref<8x32xf32, #tpu.memory_space<vmem>>, vector<8x32xf32>
    %c0_1 = arith.constant 0 : index
    %c0_2 = arith.constant 0 : index
    %1 = vector.load %arg2[%c0_1, %c0_2] : memref<32x32xf32, #tpu.memory_space<vmem>>, vector<32x32xf32>
    %cst = arith.constant dense<0.000000e+00> : vector<8x32xf32>
    %2 = tpu.matmul %0, %1, %cst {dimension_numbers = #tpu.dot_dimension_numbers<[1], [0], [0], [1], [0, 0, 1, 1], [], []>} : vector<8x32xf32>, vector<32x32xf32>, vector<8x32xf32> -> vector<8x32xf32>
    %c0_3 = arith.constant 0 : index
    %c0_4 = arith.constant 0 : index
    %3 = vector.load %arg3[%c0_3, %c0_4] : memref<1x32xf32, #tpu.memory_space<vmem>>, vector<1x32xf32>
    %4 = vector.broadcast %3 : vector<1x32xf32> to vector<8x32xf32>
    %5 = arith.addf %2, %4 : vector<8x32xf32>
    %cst_5 = arith.constant 0.000000e+00 : f32
    %6 = vector.broadcast %cst_5 : f32 to vector<8x32xf32>
    %7 = arith.maximumf %5, %6 : vector<8x32xf32>
    %c0_6 = arith.constant 0 : index
    %c0_7 = arith.constant 0 : index
    %8 = vector.load %arg4[%c0_6, %c0_7] : memref<32x128xf32, #tpu.memory_space<vmem>>, vector<32x128xf32>
    %cst_8 = arith.constant dense<0.000000e+00> : vector<8x128xf32>
    %9 = tpu.matmul %7, %8, %cst_8 {dimension_numbers = #tpu.dot_dimension_numbers<[1], [0], [0], [1], [0, 0, 1, 1], [], []>} : vector<8x32xf32>, vector<32x128xf32>, vector<8x128xf32> -> vector<8x128xf32>
    %c0_9 = arith.constant 0 : index
    %c0_10 = arith.constant 0 : index
    %10 = vector.load %arg5[%c0_9, %c0_10] : memref<1x128xf32, #tpu.memory_space<vmem>>, vector<1x128xf32>
    %11 = vector.broadcast %10 : vector<1x128xf32> to vector<8x128xf32>
    %12 = arith.addf %9, %11 : vector<8x128xf32>
    %13 = tpu.iota {dimensions = array<i32: 1>} : vector<8x128xi32>
    %c16_i32 = arith.constant 16 : i32
    %14 = vector.broadcast %c16_i32 : i32 to vector<8x128xi32>
    %15 = arith.cmpi slt, %13, %14 : vector<8x128xi32>
    %c16_i32_11 = arith.constant 16 : i32
    %16 = vector.broadcast %c16_i32_11 : i32 to vector<8x128xi32>
    %17 = arith.cmpi eq, %13, %16 : vector<8x128xi32>
    %cst_12 = arith.constant 0xFF800000 : f32
    %18 = vector.broadcast %cst_12 : f32 to vector<8x128xf32>
    %19 = arith.select %15, %12, %18 : vector<8x128xi1>, vector<8x128xf32>
    %cst_13 = arith.constant dense<0xFF800000> : vector<8xf32>
    %20 = vector.multi_reduction <maximumf>, %19, %cst_13 [1] : vector<8x128xf32> to vector<8xf32>
    %21 = vector.shape_cast %20 : vector<8xf32> to vector<8x1xf32>
    %22 = vector.broadcast %21 : vector<8x1xf32> to vector<8x128xf32>
    %23 = arith.subf %19, %22 : vector<8x128xf32>
    %24 = math.exp %23 : vector<8x128xf32>
    %cst_14 = arith.constant dense<0.000000e+00> : vector<8xf32>
    %25 = vector.multi_reduction <add>, %24, %cst_14 [1] : vector<8x128xf32> to vector<8xf32>
    %26 = vector.shape_cast %25 : vector<8xf32> to vector<8x1xf32>
    %27 = tpu.reciprocal %26 {approx = true} : vector<8x1xf32> -> vector<8x1xf32>
    %28 = vector.broadcast %27 : vector<8x1xf32> to vector<8x128xf32>
    %29 = arith.mulf %24, %28 : vector<8x128xf32>
    %cst_15 = arith.constant 0.000000e+00 : f32
    %30 = vector.broadcast %cst_15 : f32 to vector<8x128xf32>
    %31 = arith.select %17, %12, %30 : vector<8x128xi1>, vector<8x128xf32>
    %32 = arith.addf %29, %31 : vector<8x128xf32>
    %c0_16 = arith.constant 0 : index
    %c0_17 = arith.constant 0 : index
    %33 = vector.load %arg6[%c0_16, %c0_17] : memref<8x128xf32, #tpu.memory_space<vmem>>, vector<8x128xf32>
    tpu.vector_store %arg6[%c0_16, %c0_17], %32 {strides = array<i32>} : memref<8x128xf32, #tpu.memory_space<vmem>>, vector<8x128xf32>,
    return
  }
  func.func @transform_0(%arg0: i32) -> (i32, i32) {
    %c0_i32 = arith.constant 0 : i32
    %c0_i32_0 = arith.constant 0 : i32
    return %arg0, %c0_i32 : i32, i32
  }
  func.func @transform_1(%arg0: i32) -> (i32, i32) {
    %c0_i32 = arith.constant 0 : i32
    %c0_i32_0 = arith.constant 0 : i32
    %c0_i32_1 = arith.constant 0 : i32
    return %c0_i32, %c0_i32_0 : i32, i32
  }
  func.func @transform_2(%arg0: i32) -> (i32, i32) {
    %c0_i32 = arith.constant 0 : i32
    %c0_i32_0 = arith.constant 0 : i32
    %c0_i32_1 = arith.constant 0 : i32
    return %c0_i32, %c0_i32_0 : i32, i32
  }
  func.func @transform_3(%arg0: i32) -> (i32, i32) {
    %c0_i32 = arith.constant 0 : i32
    %c0_i32_0 = arith.constant 0 : i32
    %c0_i32_1 = arith.constant 0 : i32
    return %c0_i32, %c0_i32_0 : i32, i32
  }
  func.func @transform_4(%arg0: i32) -> (i32, i32) {
    %c0_i32 = arith.constant 0 : i32
    %c0_i32_0 = arith.constant 0 : i32
    %c0_i32_1 = arith.constant 0 : i32
    return %c0_i32, %c0_i32_0 : i32, i32
  }
  func.func @transform_5(%arg0: i32) -> (i32, i32) {
    %c0_i32 = arith.constant 0 : i32
    %c0_i32_0 = arith.constant 0 : i32
    return %arg0, %c0_i32 : i32, i32
  }
}

</mosaic_0001>

<bundles_post_ra>
// kernel: actor_critic_forward.1
= control target key start
LH: loop header
LB: loop body
LE: loop exit
PB: predicated region body
PF: predicated region fallthrough
CT: control target
= control target key end

     0   :  { %v267_v0 = vmov 0.0|0.0   ;;  %vm268_vm0 = vmmov 0   ;;  %v269_v4 = vmov 0.0   ;;  %vm32_vm1 = vcmask 261120   ;;  %s336_s1 = inlined_call_operand.vmem [shape: f32[32,32], index: 1, kind: input, shape index: {}]   ;;  %s337_s3 = inlined_call_operand.vmem [shape: f32[32,128], index: 3, kind: input, shape index: {}]   ;;  %s338_s0 = inlined_call_operand.vmem [shape: f32[8,32], index: 0, kind: input, shape index: {}]   ;;  %s339_s2 = inlined_call_operand.vmem [shape: f32[1,32], index: 2, kind: input, shape index: {}]   ;;  %s340_s4 = inlined_call_operand.vmem [shape: f32[1,128], index: 4, kind: input, shape index: {}]   ;;  %s341_s5 = inlined_call_operand.vmem [shape: f32[8,128], index: 5, kind: output, shape index: {}]  }
   0x1   :  { %248 = vmatprep.subr.bf16.mxu0 %v267_v0  ;;  %v21_v1 = vld [vmem:[%s336_s1] sm:$0xff]  ;;  %v22_v2 = vld [vmem:[%s336_s1 + $0x8] sm:$0xff]  ;;  %v23_v3 = vld [vmem:[%s336_s1 + $0x10] sm:$0xff]  ;;  %234 = vmatprep.mubr.msk.f32.mxu0 %vm268_vm0, %v269_v4  ;;  %v191_v20 = vlaneseq }
   0x2   :  { %v249_v5 = vpack.c.bf16 %v22_v2, %v21_v1  ;;  %v24_v6 = vld [vmem:[%s336_s1 + $0x18] sm:$0xff]  ;;  %254 = vmatprep.subr.bf16.mxu1 %v267_v0  ;;  %v107_v7 = vld [vmem:[%s337_s3] sm:$0xff]  ;;  %245 = vmatprep.mubr.msk.f32.mxu1 %vm268_vm0, %v269_v4  ;;  %v108_v8 = vld [vmem:[%s337_s3 + $0x8] sm:$0xff] }
   0x3   :  { %v252_v9 = vpack.c.bf16 %v24_v6, %v23_v3  ;;  %v255_v10 = vpack.c.bf16 %v108_v8, %v107_v7  ;;  %v20_v11 = vld [vmem:[%s338_s0] sm:$0xff]  ;;  %v109_v12 = vld [vmem:[%s337_s3 + $0x10] sm:$0xff]  ;;  %v110_v13 = vld [vmem:[%s337_s3 + $0x18] sm:$0xff]  ;;  %v192_v21 = vand.u32 127, %v191_v20 }
   0x4   :  { %250 = vmatpush3.bf16.msra.mxu0 %v249_v5  ;;  %v258_v14 = vpack.c.bf16 %v110_v13, %v109_v12  ;;  %v212_v15 = vld [vmem:[%s339_s2] ss:$0 sm:$0xff] }
   0x5   :  { %251 = vmatprep.subr.bf16.mxu0 %v267_v0  ;;  %256 = vmatpush3.bf16.msra.mxu1 %v255_v10  ;;  %v214_v22 = vld [vmem:[%s340_s4] ss:$0 sm:$0xff]  ;;  %vm194_vm2 = vcmp.eq.s32.totalorder %v192_v21, 16  ;;  %vm193_vm3 = vcmp.lt.s32.totalorder %v192_v21, 16 }
   0x6   :  { %257 = vmatprep.subr.bf16.mxu1 %v267_v0 }
   0x8   :  { %253 = vmatpush3.bf16.msra.mxu0 %v252_v9 }
   0x9   :  { %259 = vmatpush3.bf16.msra.mxu1 %v258_v14 }
   0xb   :  { %235 = vmatmul.mubr.msk.f32.vlgmr.msra.gmra.mrb[0].mxu0 %vm32_vm1, %v20_v11 }
  0xde   :  { %v102_v16 = vpop.f32.mrb[0].mxu0 }
  0xdf   :  { %v103_v17 = vadd.f32 %v212_v15, %v102_v16  ;;  %v236_v18 = vpop.f32.mrb[1].mxu0 }
  0xe1   :  { %v106_v19 = vmax.f32 %v103_v17, 0.0 }
  0xe3   :  { %246 = vmatmul.mubr.msk.f32.vlgmr.msra.gmra.mrb[0].mxu1 %vm32_vm1, %v106_v19 }
 0x1b6   :  { %v187_v23 = vpop.f32.mrb[0].mxu1 }
 0x1b7   :  { %v188_v24 = vadd.f32 %v214_v22, %v187_v23  ;;  %v247_v25 = vpop.f32.mrb[1].mxu1 }
 0x1b9   :  { %v205_v26 = vsel %vm194_vm2, %v188_v24, 0.0  ;;  %v195_v27 = vsel %vm193_vm3, %v188_v24, -inf }
 0x1ba   :  { %196 = vmax.xlane.f32.xlu0 %v195_v27 }
 0x247   :  { %v197_v28 = vpop.xlane.xlu0 %196 }
 0x248   :  { %v198_v29 = vsub.f32 %v195_v27, %v197_v28 }
 0x24a   :  { %v199_v30 = vmul.f32 1.442695, %v198_v29 }
 0x24c   :  { %263 = vpow2.f32 %v199_v30 }
 0x256   :  { %v264_v31 = vpop.eup %263 }
 0x257   :  { %201 = vadd.xlane.f32.xlu0 %v264_v31 }
 0x2e4   :  { %v202_v32 = vpop.xlane.xlu0 %201 }
 0x2e5   :  { %265 = vrcp.f32 %v202_v32 }
 0x2ef   :  { %v266_v33 = vpop.eup %265 }
 0x2f0   :  { %v204_v34 = vmul.f32 %v266_v33, %v264_v31 }
 0x2f2   :  { %v206_v35 = vadd.f32 %v205_v26, %v204_v34 }
 0x2f4   :  { %207 = vst [vmem:[%s341_s5] sm:$0xff] %v206_v35 }

</bundles_post_ra>
